<compile_context>
chip_gen: v5e
topology: v5e:2x2
jax: 0.10.0
libtpu: 0.0.40
codegen_flags: <defaults>
</compile_context>

<pallas_src>
import functools

import jax
import jax.numpy as jnp
from jax import lax
from jax.experimental import pallas as pl
from jax.experimental.pallas import tpu as pltpu


_VMEM_LIMIT = 48 * 1024 * 1024  # fits v5e/v6e (128 MiB) and v7x (64 MiB) physical VMEM


def _pick_tile(n, candidates):
    for c in candidates:
        if n % c == 0:
            return c
    return n


# ---------------------------------------------------------------------------
# Fused linear kernel: y = x @ W + b   (bf16 MXU inputs, f32 accumulation)
# Grid: (M/tm parallel, N/tn parallel, K/tk arbitrary) with f32 accumulator.
# ---------------------------------------------------------------------------
def _linear_kernel(x_ref, w_ref, b_ref, o_ref, acc_ref):
    @pl.when(pl.program_id(2) == 0)
    def _():
        acc_ref[...] = jnp.zeros_like(acc_ref)

    acc_ref[...] += jnp.dot(
        x_ref[...].astype(jnp.bfloat16), w_ref[...],
        preferred_element_type=jnp.float32)

    @pl.when(pl.program_id(2) == pl.num_programs(2) - 1)
    def _():
        o_ref[...] = (acc_ref[...] + b_ref[...]).astype(o_ref.dtype)


def linear(x, w_t, b_row, *, out_dtype):
    """x: (M, K) (any float dtype), w_t: (K, N) bf16, b_row: (1, N) f32."""
    M, K = x.shape
    K2, N = w_t.shape
    assert K == K2
    tm = _pick_tile(M, (512, 256, 128, 64, 32, 16, 8))
    tn = _pick_tile(N, (512, 384, 256, 128))
    tk = _pick_tile(K, (512, 256, 128))
    return pl.pallas_call(
        _linear_kernel,
        grid=(M // tm, N // tn, K // tk),
        in_specs=[
            pl.BlockSpec((tm, tk), lambda i, j, k: (i, k)),
            pl.BlockSpec((tk, tn), lambda i, j, k: (k, j)),
            pl.BlockSpec((1, tn), lambda i, j, k: (0, j)),
        ],
        out_specs=pl.BlockSpec((tm, tn), lambda i, j, k: (i, j)),
        out_shape=jax.ShapeDtypeStruct((M, N), out_dtype),
        scratch_shapes=[pltpu.VMEM((tm, tn), jnp.float32)],
        compiler_params=pltpu.CompilerParams(
            dimension_semantics=("parallel", "parallel", "arbitrary"),
            vmem_limit_bytes=_VMEM_LIMIT),
    )(x, w_t, b_row)


# ---------------------------------------------------------------------------
# Flash attention fused with the output projection (default path).
# Reads q/k/v as lane-dense all-head (·, D) column blocks of the qkv tensor,
# keeps per-head online-softmax state in VMEM scratch, and applies
# o @ Wproj + b in the epilogue so the (B, S, D) output is written once.
# ---------------------------------------------------------------------------
def _flash_proj_kernel(q_ref, k_ref, v_ref, wp_ref, bp_ref, o_ref,
                       m_sc, l_sc, acc_sc, *, scale, num_heads):
    kv = pl.program_id(2)

    @pl.when(kv == 0)
    def _():
        m_sc[...] = jnp.full_like(m_sc[...], -jnp.inf)
        l_sc[...] = jnp.zeros_like(l_sc[...])
        acc_sc[...] = jnp.zeros_like(acc_sc[...])

    H = num_heads
    D = q_ref.shape[-1]
    Dh = D // H

    q2 = q_ref[0] * scale          # fold softmax scale into q (tq, D) bf16
    k2 = k_ref[0]                  # (tk, D) bf16
    v2 = v_ref[0]                  # (tk, D) bf16

    # Per-head scores (static unroll over heads): (H, tq, tk) f32 on the MXU.
    s = jnp.stack([
        lax.dot_general(q2[:, h * Dh:(h + 1) * Dh],
                        k2[:, h * Dh:(h + 1) * Dh],
                        (((1,), (1,)), ((), ())),
                        preferred_element_type=jnp.float32)
        for h in range(H)])

    m_prev = m_sc[...]
    m_new = jnp.maximum(m_prev, s.max(axis=-1, keepdims=True))
    alpha = jnp.exp(m_prev - m_new)
    p = jnp.exp(s - m_new)
    l_sc[...] = alpha * l_sc[...] + p.sum(axis=-1, keepdims=True)
    pb = p.astype(v2.dtype)
    pv = jnp.stack([
        jnp.dot(pb[h], v2[:, h * Dh:(h + 1) * Dh],
                preferred_element_type=jnp.float32)
        for h in range(H)])        # (H, tq, Dh) f32
    acc_sc[...] = alpha * acc_sc[...] + pv
    m_sc[...] = m_new

    @pl.when(kv == pl.num_programs(2) - 1)
    def _():
        inv_l = pl.reciprocal(l_sc[...], approx=True)          # (H, tq, 1)
        o = acc_sc[...] * inv_l                                 # (H, tq, Dh)
        # Re-pack heads into the lane-dense (tq, D) layout and fuse proj.
        o2 = jnp.concatenate([o[h] for h in range(H)], axis=-1)
        y = jnp.dot(o2.astype(jnp.bfloat16), wp_ref[...],
                    preferred_element_type=jnp.float32) + bp_ref[...]
        o_ref[0] = y.astype(o_ref.dtype)


def _attn_tile(S):
    if S % 256 == 0:
        return 256     # matches the 2x256^2 MXU on v6e/v7x, halves grid steps
    return _pick_tile(S, (128, 64, 32, 16, 8))


def flash_attention_proj(qkv, wproj_t, bproj_row, scale, *, num_heads, out_dtype):
    """qkv: (B, S, 3*D) bf16 -> (B, S, D) out_dtype (proj already applied)."""
    B, S, threeD = qkv.shape
    D = threeD // 3
    assert D % 128 == 0, "all-head lane-dense blocks need D % 128 == 0"  # TODO(synk): general D
    assert D % num_heads == 0
    Dh = D // num_heads
    tq = tk = _attn_tile(S)
    kern = functools.partial(_flash_proj_kernel, scale=scale, num_heads=num_heads)
    return pl.pallas_call(
        kern,
        grid=(B, S // tq, S // tk),
        in_specs=[
            pl.BlockSpec((1, tq, D), lambda b, qi, ki: (b, qi, 0)),   # q cols
            pl.BlockSpec((1, tk, D), lambda b, qi, ki: (b, ki, 1)),   # k cols
            pl.BlockSpec((1, tk, D), lambda b, qi, ki: (b, ki, 2)),   # v cols
            pl.BlockSpec((D, D), lambda b, qi, ki: (0, 0)),           # Wproj (resident)
            pl.BlockSpec((1, D), lambda b, qi, ki: (0, 0)),           # bproj
        ],
        out_specs=pl.BlockSpec((1, tq, D), lambda b, qi, ki: (b, qi, 0)),
        out_shape=jax.ShapeDtypeStruct((B, S, D), out_dtype),
        scratch_shapes=[
            pltpu.VMEM((num_heads, tq, 1), jnp.float32),    # running max
            pltpu.VMEM((num_heads, tq, 1), jnp.float32),    # running denom
            pltpu.VMEM((num_heads, tq, Dh), jnp.float32),   # output accumulator
        ],
        compiler_params=pltpu.CompilerParams(
            dimension_semantics=("parallel", "parallel", "arbitrary"),
            vmem_limit_bytes=_VMEM_LIMIT),
    )(qkv, qkv, qkv, wproj_t, bproj_row)


# ---------------------------------------------------------------------------
# weight_output=True path: fused attention + proj that also emits the
# normalized attention weights (bf16 to halve the (B,H,S,S) HBM writeback).
# TODO(synk): for very large S, tile the kv axis here as in the flash kernel.
# ---------------------------------------------------------------------------
def _attn_weights_proj_kernel(q_ref, k_ref, v_ref, wp_ref, bp_ref,
                              o_ref, w_ref, *, scale, num_heads):
    H = num_heads
    D = q_ref.shape[-1]
    Dh = D // H

    q2 = q_ref[0] * scale          # (tq, D) bf16
    k2 = k_ref[0]                  # (S, D) bf16
    v2 = v_ref[0]                  # (S, D) bf16

    s = jnp.stack([
        lax.dot_general(q2[:, h * Dh:(h + 1) * Dh],
                        k2[:, h * Dh:(h + 1) * Dh],
                        (((1,), (1,)), ((), ())),
                        preferred_element_type=jnp.float32)
        for h in range(H)])                                   # (H, tq, S)
    m = s.max(axis=-1, keepdims=True)
    p = jnp.exp(s - m)
    attn = p / p.sum(axis=-1, keepdims=True)                  # (H, tq, S) f32

    pb = attn.astype(v2.dtype)
    o = jnp.concatenate([
        jnp.dot(pb[h], v2[:, h * Dh:(h + 1) * Dh],
                preferred_element_type=jnp.float32)
        for h in range(H)], axis=-1)                           # (tq, D) f32
    y = jnp.dot(o.astype(jnp.bfloat16), wp_ref[...],
                preferred_element_type=jnp.float32) + bp_ref[...]
    o_ref[0] = y.astype(o_ref.dtype)
    w_ref[0] = attn.astype(w_ref.dtype)


def attention_with_weights_proj(qkv, wproj_t, bproj_row, scale, *,
                                num_heads, out_dtype):
    B, S, threeD = qkv.shape
    D = threeD // 3
    assert D % 128 == 0 and D % num_heads == 0
    tq = _attn_tile(S)
    kern = functools.partial(_attn_weights_proj_kernel, scale=scale,
                             num_heads=num_heads)
    return pl.pallas_call(
        kern,
        grid=(B, S // tq),
        in_specs=[
            pl.BlockSpec((1, tq, D), lambda b, qi: (b, qi, 0)),
            pl.BlockSpec((1, S, D), lambda b, qi: (b, 0, 1)),
            pl.BlockSpec((1, S, D), lambda b, qi: (b, 0, 2)),
            pl.BlockSpec((D, D), lambda b, qi: (0, 0)),
            pl.BlockSpec((1, D), lambda b, qi: (0, 0)),
        ],
        out_specs=(
            pl.BlockSpec((1, tq, D), lambda b, qi: (b, qi, 0)),
            pl.BlockSpec((1, num_heads, tq, S), lambda b, qi: (b, 0, qi, 0)),
        ),
        out_shape=(
            jax.ShapeDtypeStruct((B, S, D), out_dtype),
            jax.ShapeDtypeStruct((B, num_heads, S, S), jnp.bfloat16),
        ),
        compiler_params=pltpu.CompilerParams(
            dimension_semantics=("parallel", "parallel"),
            vmem_limit_bytes=_VMEM_LIMIT),
    )(qkv, qkv, qkv, wproj_t, bproj_row)


# ---------------------------------------------------------------------------
# Parameters (one-time layout prep: pre-transposed bf16 weights, f32 bias rows)
# ---------------------------------------------------------------------------
def init_params(key, dim=128, num_heads=8):
    k1, k2, k3, k4 = jax.random.split(key, 4)
    std = dim ** -0.5
    wqkv = jax.random.normal(k1, (3 * dim, dim), jnp.float32) * std   # torch (out, in)
    bqkv = jax.random.normal(k2, (3 * dim,), jnp.float32) * 0.02
    wproj = jax.random.normal(k3, (dim, dim), jnp.float32) * std
    bproj = jax.random.normal(k4, (dim,), jnp.float32) * 0.02
    return dict(
        num_heads=num_heads,
        # f32 masters (used only by the pure-JAX reference check)
        wqkv=wqkv, bqkv=bqkv, wproj=wproj, bproj=bproj,
        # kernel layouts, computed once (not per forward call)
        wqkv_t=jnp.transpose(wqkv).astype(jnp.bfloat16),
        bqkv_row=bqkv.reshape(1, -1),
        wproj_t=jnp.transpose(wproj).astype(jnp.bfloat16),
        bproj_row=bproj.reshape(1, -1),
    )


# ---------------------------------------------------------------------------
# Forward (mirrors AttentionWithWeightSharing.forward; dropout p=0 -> identity)
# ---------------------------------------------------------------------------
def attention_forward(params, x, weight_output=False, out_dtype=jnp.bfloat16):
    B, S, D = x.shape
    H = params['num_heads']
    assert D % H == 0, 'dim should be divisible by num_heads'
    Dh = D // H
    scale = float(Dh) ** -0.5

    # QKV projection (x is cast to bf16 inside the kernel; no standalone cast).
    qkv = linear(x.reshape(B * S, D), params['wqkv_t'], params['bqkv_row'],
                 out_dtype=jnp.bfloat16)
    qkv = qkv.reshape(B, S, 3 * D)   # free view; q/k/v live in column blocks 0/1/2

    if weight_output:
        out, attn = attention_with_weights_proj(
            qkv, params['wproj_t'], params['bproj_row'], scale,
            num_heads=H, out_dtype=out_dtype)
        return out, attn

    out = flash_attention_proj(
        qkv, params['wproj_t'], params['bproj_row'], scale,
        num_heads=H, out_dtype=out_dtype)
    return out, None


# ---------------------------------------------------------------------------
# Pure-JAX reference (f32) for correctness checking
# ---------------------------------------------------------------------------
def reference_forward(params, x):
    B, S, D = x.shape
    H = params['num_heads']
    Dh = D // H
    scale = Dh ** -0.5
    qkv = x @ params['wqkv'].T + params['bqkv']
    qkv = qkv.reshape(B, S, 3, H, Dh).transpose(2, 0, 3, 1, 4)
    q, k, v = qkv[0], qkv[1], qkv[2]
    s = jnp.einsum('bhqd,bhkd->bhqk', q, k) * scale
    attn = jax.nn.softmax(s, axis=-1)
    o = jnp.einsum('bhqk,bhkd->bhqd', attn, v)
    o = o.transpose(0, 2, 1, 3).reshape(B, S, D)
    out = o @ params['wproj'].T + params['bproj']
    return out, attn


# ---------------------------------------------------------------------------
if __name__ == "__main__":
    key = jax.random.PRNGKey(0)
    pkey, xkey = jax.random.split(key)

    B, S, D, H = 2, 128, 128, 8   # head_dim = 16, lane-dense all-head blocks
    params = init_params(pkey, dim=D, num_heads=H)
    x = jax.random.normal(xkey, (B, S, D), jnp.float32)

    # Default path: (x, None)
    out, attn_none = attention_forward(params, x, weight_output=False)
    # weight_output path: (x, attn_weight)
    out_w, attn = attention_forward(params, x, weight_output=True)
    jax.block_until_ready((out, out_w, attn))

    ref_out, ref_attn = reference_forward(params, x)

    assert out.shape == (B, S, D) and attn_none is None
    assert out_w.shape == (B, S, D) and attn.shape == (B, H, S, S)

    out_f = out.astype(jnp.float32)
    out_w_f = out_w.astype(jnp.float32)
    attn_f = attn.astype(jnp.float32)
    assert bool(jnp.all(jnp.isfinite(out_f))) and bool(jnp.all(jnp.isfinite(out_w_f)))

    err_flash = float(jnp.max(jnp.abs(out_f - ref_out)))
    err_full = float(jnp.max(jnp.abs(out_w_f - ref_out)))
    err_attn = float(jnp.max(jnp.abs(attn_f - ref_attn)))
    row_sum_err = float(jnp.max(jnp.abs(attn_f.sum(-1) - 1.0)))
    assert err_flash < 0.12, f"flash path mismatch: {err_flash}"
    assert err_full < 0.12, f"weight path mismatch: {err_full}"
    assert err_attn < 0.02, f"attn weights mismatch: {err_attn}"
    assert row_sum_err < 0.01, f"softmax rows not normalized: {row_sum_err}"

    print("KERNEL_OK")
</pallas_src>

<mosaic_0001>
module attributes {stable_mosaic.version = 11 : i64} {
  func.func @_linear_kernel(%arg0: i32, %arg1: i32, %arg2: i32, %arg3: memref<256x128xf32, #tpu.memory_space<vmem>>, %arg4: memref<128x384xbf16, #tpu.memory_space<vmem>>, %arg5: memref<1x384xf32, #tpu.memory_space<vmem>>, %arg6: memref<256x384xbf16, #tpu.memory_space<vmem>>, %arg7: memref<256x384xf32, #tpu.memory_space<vmem>>) attributes {dimension_semantics = [#tpu.dimension_semantics<parallel>, #tpu.dimension_semantics<parallel>, #tpu.dimension_semantics<arbitrary>], iteration_bounds = array<i64: 1, 1, 1>, scalar_prefetch = 0 : i64, scratch_operands = 1 : i64, tpu.core_type = #tpu.core_type<tc>, window_params = [{transform_indices = @transform_0, window_bounds = array<i64: 256, 128>}, {transform_indices = @transform_1, window_bounds = array<i64: 128, 384>}, {transform_indices = @transform_2, window_bounds = array<i64: 1, 384>}, {transform_indices = @transform_3, window_bounds = array<i64: 256, 384>}]} {
    %c0_i32 = arith.constant 0 : i32
    %0 = arith.cmpi eq, %arg2, %c0_i32 : i32
    %1 = arith.extui %0 : i1 to i32
    %c0_i32_0 = arith.constant 0 : i32
    %2 = arith.cmpi ne, %1, %c0_i32_0 : i32
    scf.if %2 {
      %cst_10 = arith.constant 0.000000e+00 : f32
      %13 = vector.broadcast %cst_10 : f32 to vector<256x384xf32>
      %c0_11 = arith.constant 0 : index
      %c0_12 = arith.constant 0 : index
      %14 = vector.load %arg7[%c0_11, %c0_12] : memref<256x384xf32, #tpu.memory_space<vmem>>, vector<256x384xf32>
      tpu.vector_store %arg7[%c0_11, %c0_12], %13 {strides = array<i32>} : memref<256x384xf32, #tpu.memory_space<vmem>>, vector<256x384xf32>,
    } else {
    }
    %c0 = arith.constant 0 : index
    %c0_1 = arith.constant 0 : index
    %3 = vector.load %arg7[%c0, %c0_1] : memref<256x384xf32, #tpu.memory_space<vmem>>, vector<256x384xf32>
    %c0_2 = arith.constant 0 : index
    %c0_3 = arith.constant 0 : index
    %4 = vector.load %arg3[%c0_2, %c0_3] : memref<256x128xf32, #tpu.memory_space<vmem>>, vector<256x128xf32>
    %5 = arith.truncf %4 : vector<256x128xf32> to vector<256x128xbf16>
    %c0_4 = arith.constant 0 : index
    %c0_5 = arith.constant 0 : index
    %6 = vector.load %arg4[%c0_4, %c0_5] : memref<128x384xbf16, #tpu.memory_space<vmem>>, vector<128x384xbf16>
    %cst = arith.constant dense<0.000000e+00> : vector<256x384xf32>
    %7 = tpu.matmul %5, %6, %cst {dimension_numbers = #tpu.dot_dimension_numbers<[1], [0], [0], [1], [0, 0, 1, 1], [], []>} : vector<256x128xbf16>, vector<128x384xbf16>, vector<256x384xf32> -> vector<256x384xf32>
    %8 = arith.addf %3, %7 : vector<256x384xf32>
    %c0_6 = arith.constant 0 : index
    %c0_7 = arith.constant 0 : index
    %9 = vector.load %arg7[%c0_6, %c0_7] : memref<256x384xf32, #tpu.memory_space<vmem>>, vector<256x384xf32>
    tpu.vector_store %arg7[%c0_6, %c0_7], %8 {strides = array<i32>} : memref<256x384xf32, #tpu.memory_space<vmem>>, vector<256x384xf32>,
    %c0_i32_8 = arith.constant 0 : i32
    %10 = arith.cmpi eq, %arg2, %c0_i32_8 : i32
    %11 = arith.extui %10 : i1 to i32
    %c0_i32_9 = arith.constant 0 : i32
    %12 = arith.cmpi ne, %11, %c0_i32_9 : i32
    scf.if %12 {
      %c0_10 = arith.constant 0 : index
      %c0_11 = arith.constant 0 : index
      %13 = vector.load %arg7[%c0_10, %c0_11] : memref<256x384xf32, #tpu.memory_space<vmem>>, vector<256x384xf32>
      %c0_12 = arith.constant 0 : index
      %c0_13 = arith.constant 0 : index
      %14 = vector.load %arg5[%c0_12, %c0_13] : memref<1x384xf32, #tpu.memory_space<vmem>>, vector<1x384xf32>
      %15 = vector.broadcast %14 : vector<1x384xf32> to vector<256x384xf32>
      %16 = arith.addf %13, %15 : vector<256x384xf32>
      %17 = arith.truncf %16 : vector<256x384xf32> to vector<256x384xbf16>
      %c0_14 = arith.constant 0 : index
      %c0_15 = arith.constant 0 : index
      %18 = vector.load %arg6[%c0_14, %c0_15] : memref<256x384xbf16, #tpu.memory_space<vmem>>, vector<256x384xbf16>
      tpu.vector_store %arg6[%c0_14, %c0_15], %17 {strides = array<i32>} : memref<256x384xbf16, #tpu.memory_space<vmem>>, vector<256x384xbf16>,
    } else {
    }
    return
  }
  func.func @transform_0(%arg0: i32, %arg1: i32, %arg2: i32) -> (i32, i32) {
    %c0_i32 = arith.constant 0 : i32
    return %arg0, %arg2 : i32, i32
  }
  func.func @transform_1(%arg0: i32, %arg1: i32, %arg2: i32) -> (i32, i32) {
    %c0_i32 = arith.constant 0 : i32
    return %arg2, %arg1 : i32, i32
  }
  func.func @transform_2(%arg0: i32, %arg1: i32, %arg2: i32) -> (i32, i32) {
    %c0_i32 = arith.constant 0 : i32
    %c0_i32_0 = arith.constant 0 : i32
    return %c0_i32, %arg1 : i32, i32
  }
  func.func @transform_3(%arg0: i32, %arg1: i32, %arg2: i32) -> (i32, i32) {
    %c0_i32 = arith.constant 0 : i32
    return %arg0, %arg1 : i32, i32
  }
}

</mosaic_0001>

<bundles_post_ra>
// kernel: tpu_custom_call.1
= control target key start
LH: loop header
LB: loop body
LE: loop exit
PB: predicated region body
PF: predicated region fallthrough
CT: control target
= control target key end

     0   :  { %8 = vsyncpa [#allocation4], 0  ;;  %s1768_s0 = inlined_call_operand.hbm [shape: f32[256,128], index: 0, kind: input, shape index: {}]   ;;  %s1769_s1 = inlined_call_operand.hbm [shape: bf16[128,384], index: 1, kind: input, shape index: {}]   ;;  %s1770_s2 = inlined_call_operand.hbm [shape: f32[1,384], index: 2, kind: input, shape index: {}]   ;;  %s1771_s3 = inlined_call_operand.hbm [shape: bf16[256,384], index: 3, kind: output, shape index: {}]  }
   0x1   :  { %9 = vsyncpa [#allocation7], 0  ;;  %s28_s14 = sshll.u32 %s1769_s1, 4  ;;  %s29_s14 = int_to_ptr.hbm [resolvable:$true] %s28_s14 }
   0x2   :  { %10 = vsyncpa [#allocation5], 0  ;;  %s1528_s15 = smov [#allocation6]   ;;  %s15_s19 = sshll.u32 %s1768_s0, 4  ;;  %s16_s19 = int_to_ptr.hbm [resolvable:$true] %s15_s19 }
   0x3   :  { %s30_s16 = sshll.u32 %s1528_s15, 4  ;;  %s1529_s20 = smov 192   ;;  %s31_s16 = int_to_ptr.vmem [resolvable:$true] %s30_s16 }
   0x4   :  { %s1530_s21 = smov 12   ;;  %s1531_s22 = smov [#allocation3]  }
   0x5   :  { %36 = dma.hbm_to_vmem [thread:$0]  %s29_s14, 3072, %s31_s16, [#allocation7], %s1529_s20, %s1529_s20, %s1530_s21  }
   0x6   :  { %s17_s23 = sshll.u32 %s1531_s22, 4  ;;  %s1532_s1 = smov 128   ;;  %s18_s23 = int_to_ptr.vmem [resolvable:$true] %s17_s23 }
   0x7   :  { %s1533_s24 = smov 8   ;;  %s42_s27 = sshll.u32 %s1770_s2, 4  ;;  %s43_s27 = int_to_ptr.hbm [resolvable:$true] %s42_s27 }
   0x8   :  { %23 = dma.hbm_to_vmem [thread:$0]  %s16_s19, 4096, %s18_s23, [#allocation4], %s1532_s1, %s1532_s1, %s1533_s24  }
   0x9   :  { %s1534_s28 = smov [#allocation8]  }
   0xa   :  { %s44_s0 = sshll.u32 %s1534_s28, 4  ;;  %s45_s0 = int_to_ptr.vmem [resolvable:$true] %s44_s0 }
   0xb   :  { %47 = dma.hbm_to_vmem [thread:$0]  %s43_s27, 48, %s45_s0, [#allocation7]  }
   0xc   :  { %1522 = dma.done.wait [#allocation4], 4096  }
   0xd   :  { %1523 = vsyncadd [#allocation4], 4294963200 }
   0xe   :  { %1524 = dma.done.wait [#allocation7], 3120  }
   0xf   :  { %1525 = vsyncadd [#allocation7], 4294964176  ;;  %v1360_v0 = vld [vmem:[#allocation6 + $0xa8] sm:$0xf]  ;;  %v1392_v1 = vld [vmem:[#allocation6 + $0xb0] sm:$0xf0] }
  0x10   :  { %v1391_v2 = vld [vmem:[#allocation6 + $0xac] sm:$0xf]  ;;  %v1361_v3 = vor.u32 %v1392_v1, %v1360_v0  ;;  %v1362_v4 = vld [vmem:[#allocation6 + $0xb4] sm:$0xf0]  ;;  %v1368_v5 = vld [vmem:[#allocation6 + $0xb0] sm:$0xf] }
  0x11   :  { %v1393_v6 = vld [vmem:[#allocation6 + $0xb8] sm:$0xf0]  ;;  %v1568_v7 = vor.u32 %v1391_v2, %v1362_v4  ;;  %v1348_v9 = vld [vmem:[#allocation6 + $0x90] sm:$0xf]  ;;  %v1388_v11 = vld [vmem:[#allocation6 + $0x94] sm:$0xf] }
  0x12   :  { %v1570_v8 = vor.u32 %v1393_v6, %v1368_v5  ;;  %v1389_v10 = vld [vmem:[#allocation6 + $0x98] sm:$0xf0]  ;;  %464 = vmatpush.bf16.msra.mxu0 %v1361_v3  ;;  %1394 = vmatpush.bf16.msra.mxu3 %v1361_v3  ;;  %v1350_v13 = vld [vmem:[#allocation6 + $0x9c] sm:$0xf0]  ;;  %v1356_v14 = vld [vmem:[#allocation6 + $0x98] sm:$0xf] }
  0x13   :  { %v1349_v12 = vor.u32 %v1389_v10, %v1348_v9  ;;  %v1390_v15 = vld [vmem:[#allocation6 + $0xa0] sm:$0xf0]  ;;  %553 = vmatpush.bf16.msra.mxu1 %v1568_v7  ;;  %v1574_v16 = vor.u32 %v1388_v11, %v1350_v13  ;;  %v1336_v18 = vld [vmem:[#allocation6 + $0x78] sm:$0xf]  ;;  %v1385_v20 = vld [vmem:[#allocation6 + $0x7c] sm:$0xf] }
  0x14   :  { %642 = vmatpush.bf16.msra.mxu2 %v1570_v8  ;;  %v1576_v17 = vor.u32 %v1390_v15, %v1356_v14  ;;  %v1386_v19 = vld [vmem:[#allocation6 + $0x80] sm:$0xf0]  ;;  %v1338_v21 = vld [vmem:[#allocation6 + $0x84] sm:$0xf0]  ;;  %v1344_v22 = vld [vmem:[#allocation6 + $0x80] sm:$0xf] }
  0x15   :  { %v1387_v23 = vld [vmem:[#allocation6 + $0x88] sm:$0xf0]  ;;  %v1337_v24 = vor.u32 %v1386_v19, %v1336_v18  ;;  %v1580_v25 = vor.u32 %v1385_v20, %v1338_v21  ;;  %v1324_v27 = vld [vmem:[#allocation6 + $0x60] sm:$0xf]  ;;  %v1382_v29 = vld [vmem:[#allocation6 + $0x64] sm:$0xf] }
  0x16   :  { %465 = vmatpush.bf16.msra.mxu0 %v1349_v12  ;;  %1395 = vmatpush.bf16.msra.mxu3 %v1349_v12  ;;  %v1582_v26 = vor.u32 %v1387_v23, %v1344_v22  ;;  %v1383_v28 = vld [vmem:[#allocation6 + $0x68] sm:$0xf0]  ;;  %v1326_v30 = vld [vmem:[#allocation6 + $0x6c] sm:$0xf0]  ;;  %v1332_v31 = vld [vmem:[#allocation6 + $0x68] sm:$0xf] }
  0x17   :  { %554 = vmatpush.bf16.msra.mxu1 %v1574_v16  ;;  %v1384_v32 = vld [vmem:[#allocation6 + $0x70] sm:$0xf0]  ;;  %v1325_v33 = vor.u32 %v1383_v28, %v1324_v27  ;;  %v1586_v34 = vor.u32 %v1382_v29, %v1326_v30  ;;  %v1312_v36 = vld [vmem:[#allocation6 + $0x48] sm:$0xf]  ;;  %v1379_v38 = vld [vmem:[#allocation6 + $0x4c] sm:$0xf] }
  0x18   :  { %643 = vmatpush.bf16.msra.mxu2 %v1576_v17  ;;  %v1588_v35 = vor.u32 %v1384_v32, %v1332_v31  ;;  %v1380_v37 = vld [vmem:[#allocation6 + $0x50] sm:$0xf0]  ;;  %v1314_v39 = vld [vmem:[#allocation6 + $0x54] sm:$0xf0]  ;;  %v1320_v40 = vld [vmem:[#allocation6 + $0x50] sm:$0xf] }
  0x19   :  { %v1381_v41 = vld [vmem:[#allocation6 + $0x58] sm:$0xf0]  ;;  %v1313_v42 = vor.u32 %v1380_v37, %v1312_v36  ;;  %v1592_v43 = vor.u32 %v1379_v38, %v1314_v39  ;;  %v1300_v45 = vld [vmem:[#allocation6 + $0x30] sm:$0xf]  ;;  %v1376_v47 = vld [vmem:[#allocation6 + $0x34] sm:$0xf] }
  0x1a   :  { %466 = vmatpush.bf16.msra.mxu0 %v1337_v24  ;;  %1396 = vmatpush.bf16.msra.mxu3 %v1337_v24  ;;  %v1594_v44 = vor.u32 %v1381_v41, %v1320_v40  ;;  %v1377_v46 = vld [vmem:[#allocation6 + $0x38] sm:$0xf0]  ;;  %v1302_v48 = vld [vmem:[#allocation6 + $0x3c] sm:$0xf0]  ;;  %v1308_v49 = vld [vmem:[#allocation6 + $0x38] sm:$0xf] }
  0x1b   :  { %555 = vmatpush.bf16.msra.mxu1 %v1580_v25  ;;  %v1378_v50 = vld [vmem:[#allocation6 + $0x40] sm:$0xf0]  ;;  %v1301_v51 = vor.u32 %v1377_v46, %v1300_v45  ;;  %v1305_v52 = vor.u32 %v1376_v47, %v1302_v48  ;;  %v1288_v54 = vld [vmem:[#allocation6 + $0x18] sm:$0xf]  ;;  %v1373_v56 = vld [vmem:[#allocation6 + $0x1c] sm:$0xf] }
  0x1c   :  { %644 = vmatpush.bf16.msra.mxu2 %v1582_v26  ;;  %v1598_v53 = vor.u32 %v1378_v50, %v1308_v49  ;;  %v1374_v55 = vld [vmem:[#allocation6 + $0x20] sm:$0xf0]  ;;  %v1290_v57 = vld [vmem:[#allocation6 + $0x24] sm:$0xf0]  ;;  %v1296_v58 = vld [vmem:[#allocation6 + $0x20] sm:$0xf] }
  0x1d   :  { %v1375_v59 = vld [vmem:[#allocation6 + $0x28] sm:$0xf0]  ;;  %v1289_v60 = vor.u32 %v1374_v55, %v1288_v54  ;;  %v1293_v61 = vor.u32 %v1373_v56, %v1290_v57  ;;  %v1276_v63 = vld [vmem:[#allocation6] sm:$0xf]  ;;  %v1370_v1 = vld [vmem:[#allocation6 + $0x4] sm:$0xf] }
  0x1e   :  { %467 = vmatpush.bf16.msra.mxu0 %v1325_v33  ;;  %1397 = vmatpush.bf16.msra.mxu3 %v1325_v33  ;;  %v1601_v62 = vor.u32 %v1375_v59, %v1296_v58  ;;  %v1371_v0 = vld [vmem:[#allocation6 + $0x8] sm:$0xf0]  ;;  %v1278_v2 = vld [vmem:[#allocation6 + $0xc] sm:$0xf0]  ;;  %v1284_v3 = vld [vmem:[#allocation6 + $0x8] sm:$0xf] }
  0x1f   :  { %556 = vmatpush.bf16.msra.mxu1 %v1586_v34  ;;  %v1372_v4 = vld [vmem:[#allocation6 + $0x10] sm:$0xf0]  ;;  %v256_v5 = vld [vmem:[#allocation3] sm:$0xff]  ;;  %v1277_v6 = vor.u32 %v1371_v0, %v1276_v63  ;;  %v257_v9 = vld [vmem:[#allocation3 + $0x8] sm:$0xff]  ;;  %v1281_v12 = vor.u32 %v1370_v1, %v1278_v2  ;;  %s1535_s2 = smov [#allocation9]   ;;  %s1260_s5 = sshll.u32 %s1771_s3, 4  ;;  %s1261_s5 = int_to_ptr.hbm [resolvable:$true] %s1260_s5 }
  0x20   :  { %645 = vmatpush.bf16.msra.mxu2 %v1588_v35  ;;  %v280_v10 = vld [vmem:[#allocation3 + $0xc0] sm:$0xff]  ;;  %v281_v11 = vld [vmem:[#allocation3 + $0xc8] sm:$0xff]  ;;  %v1285_v13 = vor.u32 %v1372_v4, %v1284_v3  ;;  %v288_v14 = vpack.c.bf16 %v257_v9, %v256_v5  ;;  %v258_v18 = vld [vmem:[#allocation3 + $0x10] sm:$0xff]  ;;  %s1258_s29 = sshll.u32 %s1535_s2, 4  ;;  %s1259_s29 = int_to_ptr.vmem [resolvable:$true] %s1258_s29 }
  0x21   :  { %v1604_v15 = vpack.c.bf16 %v281_v11, %v280_v10  ;;  %v259_v19 = vld [vmem:[#allocation3 + $0x18] sm:$0xff]  ;;  %v282_v20 = vld [vmem:[#allocation3 + $0xd0] sm:$0xff]  ;;  %v284_v24 = vld [vmem:[#allocation3 + $0xe0] sm:$0xff] }
  0x22   :  { %468 = vmatpush.bf16.msra.mxu0 %v1313_v42  ;;  %1398 = vmatpush.bf16.msra.mxu3 %v1313_v42  ;;  %v283_v21 = vld [vmem:[#allocation3 + $0xd8] sm:$0xff]  ;;  %v289_v22 = vpack.c.bf16 %v259_v19, %v258_v18  ;;  %v262_v29 = vld [vmem:[#allocation3 + $0x30] sm:$0xff]  ;;  %v268_v38 = vld [vmem:[#allocation3 + $0x60] sm:$0xff] }
  0x23   :  { %557 = vmatpush.bf16.msra.mxu1 %v1592_v43  ;;  %v1611_v23 = vpack.c.bf16 %v283_v21, %v282_v20  ;;  %v263_v30 = vld [vmem:[#allocation3 + $0x38] sm:$0xff]  ;;  %v286_v31 = vld [vmem:[#allocation3 + $0xf0] sm:$0xff]  ;;  %v269_v39 = vld [vmem:[#allocation3 + $0x68] sm:$0xff] }
  0x24   :  { %646 = vmatpush.bf16.msra.mxu2 %v1594_v44  ;;  %v287_v32 = vld [vmem:[#allocation3 + $0xf8] sm:$0xff]  ;;  %v291_v33 = vpack.c.bf16 %v263_v30, %v262_v29  ;;  %v294_v40 = vpack.c.bf16 %v269_v39, %v268_v38  ;;  %v270_v41 = vld [vmem:[#allocation3 + $0x70] sm:$0xff]  ;;  %v272_v45 = vld [vmem:[#allocation3 + $0x80] sm:$0xff] }
  0x25   :  { %v267_v36 = vld [vmem:[#allocation3 + $0x58] sm:$0xff]  ;;  %v273_v46 = vld [vmem:[#allocation3 + $0x88] sm:$0xff]  ;;  %v274_v1 = vld [vmem:[#allocation3 + $0x90] sm:$0xff] }
  0x26   :  { %469 = vmatpush.bf16.msra.mxu0 %v1301_v51  ;;  %1399 = vmatpush.bf16.msra.mxu3 %v1301_v51  ;;  %v271_v42 = vld [vmem:[#allocation3 + $0x78] sm:$0xff]  ;;  %v296_v49 = vpack.c.bf16 %v273_v46, %v272_v45 }
  0x27   :  { %558 = vmatpush.bf16.msra.mxu1 %v1305_v52  ;;  %v275_v2 = vld [vmem:[#allocation3 + $0x98] sm:$0xff] }
  0x28   :  { %647 = vmatpush.bf16.msra.mxu2 %v1598_v53  ;;  %v297_v5 = vpack.c.bf16 %v275_v2, %v274_v1  ;;  %v279_v45 = vld [vmem:[#allocation3 + $0xb8] sm:$0xff] }
  0x2a   :  { %470 = vmatpush.bf16.msra.mxu0 %v1289_v60  ;;  %1400 = vmatpush.bf16.msra.mxu3 %v1289_v60 }
  0x2b   :  { %559 = vmatpush.bf16.msra.mxu1 %v1293_v61 }
  0x2c   :  { %648 = vmatpush.bf16.msra.mxu2 %v1601_v62 }
  0x2e   :  { %471 = vmatpush.bf16.msra.mxu0 %v1277_v6  ;;  %1401 = vmatpush.bf16.msra.mxu3 %v1277_v6 }
  0x2f   :  { %560 = vmatpush.bf16.msra.mxu1 %v1281_v12 }
  0x30   :  { %649 = vmatpush.bf16.msra.mxu2 %v1285_v13 }
  0x31   :  { %472 = vmatmul.bf16.vlgmr.msra.gmra.mxu0 %v288_v14  ;;  %532 = vmatmul.bf16.vlgmr.msra.gmra.mxu3 %v1604_v15 }
  0x32   :  { %1402 = vmatpush.bf16.msrb.mxu3 %v1568_v7  ;;  %561 = vmatmul.bf16.vlgmr.msra.gmra.mxu1 %v288_v14  ;;  %v260_v7 = vld [vmem:[#allocation3 + $0x20] sm:$0xff] }
  0x33   :  { %650 = vmatmul.bf16.vlgmr.msra.gmra.mxu2 %v288_v14 }
  0x36   :  { %1403 = vmatpush.bf16.msrb.mxu3 %v1574_v16  ;;  %v261_v16 = vld [vmem:[#allocation3 + $0x28] sm:$0xff] }
  0x37   :  { %v290_v27 = vpack.c.bf16 %v261_v16, %v260_v7 }
  0x3a   :  { %1404 = vmatpush.bf16.msrb.mxu3 %v1580_v25  ;;  %v285_v25 = vld [vmem:[#allocation3 + $0xe8] sm:$0xff] }
  0x3b   :  { %v1615_v28 = vpack.c.bf16 %v285_v25, %v284_v24  ;;  %v277_v25 = vld [vmem:[#allocation3 + $0xa8] sm:$0xff] }
  0x3e   :  { %1405 = vmatpush.bf16.msrb.mxu3 %v1586_v34  ;;  %v1622_v34 = vpack.c.bf16 %v287_v32, %v286_v31 }
  0x41   :  { %477 = vmatmul.bf16.gmra.mxu0 %v289_v22  ;;  %537 = vmatmul.bf16.gmra.mxu3 %v1611_v23 }
  0x42   :  { %1406 = vmatpush.bf16.msrb.mxu3 %v1592_v43  ;;  %566 = vmatmul.bf16.gmra.mxu1 %v289_v22  ;;  %v295_v43 = vpack.c.bf16 %v271_v42, %v270_v41 }
  0x43   :  { %655 = vmatmul.bf16.gmra.mxu2 %v289_v22 }
  0x46   :  { %1407 = vmatpush.bf16.msrb.mxu3 %v1305_v52 }
  0x4a   :  { %1408 = vmatpush.bf16.msrb.mxu3 %v1293_v61 }
  0x4e   :  { %1409 = vmatpush.bf16.msrb.mxu3 %v1281_v12 }
  0x51   :  { %482 = vmatmul.bf16.gmra.mxu0 %v290_v27  ;;  %542 = vmatmul.bf16.gmra.mxu3 %v1615_v28 }
  0x52   :  { %1410 = vmatpush.bf16.msra.mxu3 %v1570_v8  ;;  %571 = vmatmul.bf16.gmra.mxu1 %v290_v27  ;;  %v264_v8 = vld [vmem:[#allocation3 + $0x40] sm:$0xff] }
  0x53   :  { %660 = vmatmul.bf16.gmra.mxu2 %v290_v27 }
  0x56   :  { %1411 = vmatpush.bf16.msra.mxu3 %v1576_v17  ;;  %v265_v17 = vld [vmem:[#allocation3 + $0x48] sm:$0xff] }
  0x5a   :  { %1412 = vmatpush.bf16.msra.mxu3 %v1582_v26  ;;  %v292_v26 = vpack.c.bf16 %v265_v17, %v264_v8 }
  0x5e   :  { %1413 = vmatpush.bf16.msra.mxu3 %v1588_v35  ;;  %v266_v35 = vld [vmem:[#allocation3 + $0x50] sm:$0xff] }
  0x5f   :  { %v293_v37 = vpack.c.bf16 %v267_v36, %v266_v35 }
  0x61   :  { %487 = vmatmul.bf16.gmra.mxu0 %v291_v33  ;;  %547 = vmatmul.bf16.gmra.mxu3 %v1622_v34 }
  0x62   :  { %1414 = vmatpush.bf16.msra.mxu3 %v1594_v44  ;;  %576 = vmatmul.bf16.gmra.mxu1 %v291_v33  ;;  %v1022_v44 = vld [vmem:[#allocation8] sm:$0x7] }
  0x63   :  { %665 = vmatmul.bf16.gmra.mxu2 %v291_v33  ;;  %v1632_v47 = vperm.slane %v1022_v44, 0  ;;  %v1634_v48 = vperm.slane %v1022_v44, 1  ;;  %v1639_v55 = vperm.slane %v1022_v44, 2 }
  0x66   :  { %1415 = vmatpush.bf16.msra.mxu3 %v1598_v53 }
  0x6a   :  { %1416 = vmatpush.bf16.msra.mxu3 %v1601_v62 }
  0x6e   :  { %1417 = vmatpush.bf16.msra.mxu3 %v1285_v13 }
  0x71   :  { %492 = vmatmul.bf16.gmra.mxu0 %v292_v26  ;;  %621 = vmatmul.bf16.vlgmr.msrb.gmra.mxu3 %v1604_v15 }
  0x72   :  { %581 = vmatmul.bf16.gmra.mxu1 %v292_v26 }
  0x73   :  { %670 = vmatmul.bf16.gmra.mxu2 %v292_v26 }
  0x81   :  { %497 = vmatmul.bf16.gmra.mxu0 %v293_v37  ;;  %626 = vmatmul.bf16.gmra.mxu3 %v1611_v23 }
  0x82   :  { %586 = vmatmul.bf16.gmra.mxu1 %v293_v37 }
  0x83   :  { %675 = vmatmul.bf16.gmra.mxu2 %v293_v37 }
  0x91   :  { %502 = vmatmul.bf16.gmra.mxu0 %v294_v40  ;;  %631 = vmatmul.bf16.gmra.mxu3 %v1615_v28 }
  0x92   :  { %591 = vmatmul.bf16.gmra.mxu1 %v294_v40 }
  0x93   :  { %680 = vmatmul.bf16.gmra.mxu2 %v294_v40 }
  0xa1   :  { %507 = vmatmul.bf16.gmra.mxu0 %v295_v43  ;;  %636 = vmatmul.bf16.gmra.mxu3 %v1622_v34 }
  0xa2   :  { %596 = vmatmul.bf16.gmra.mxu1 %v295_v43 }
  0xa3   :  { %685 = vmatmul.bf16.gmra.mxu2 %v295_v43 }
  0xae   :  { %v473_v50 = vpop.f32.mrf.mxu0 }
  0xaf   :  { %v1030_v51 = vadd.f32 %v1632_v47, %v473_v50  ;;  %v562_v52 = vpop.f32.mrf.mxu1 }
  0xb0   :  { %v1031_v53 = vadd.f32 %v1634_v48, %v562_v52 }
  0xb1   :  { %512 = vmatmul.bf16.gmra.mxu0 %v296_v49  ;;  %710 = vmatmul.bf16.vlgmr.msra.gmra.mxu3 %v1604_v15 }
  0xb2   :  { %v1126_v54 = vpack.c.bf16 %v1031_v53, %v1030_v51  ;;  %601 = vmatmul.bf16.gmra.mxu1 %v296_v49 }
  0xb3   :  { %690 = vmatmul.bf16.gmra.mxu2 %v296_v49 }
  0xb4   :  { %1190 = vst [vmem:[#allocation9] sm:$0xff] %v1126_v54  ;;  %v1641_v56 = vpop.f32.mrf.mxu3 }
  0xb6   :  { %v651_v57 = vpop.f32.mrf.mxu2  ;;  %v475_v59 = vpop.f32.mrf.mxu0 }
  0xb7   :  { %v1032_v58 = vadd.f32 %v1639_v55, %v651_v57  ;;  %v1033_v60 = vadd.f32 %v1632_v47, %v475_v59  ;;  %v564_v61 = vpop.f32.mrf.mxu1 }
  0xb8   :  { %v1034_v63 = vadd.f32 %v1634_v48, %v564_v61 }
  0xb9   :  { %v1127_v62 = vpack.c.bf16 %v1032_v58, %v1032_v58 }
  0xba   :  { %v1128_v0 = vpack.c.bf16 %v1034_v63, %v1033_v60 }
  0xbb   :  { %1191 = vst [vmem:[#allocation9 + $0x8] sm:$0xf] %v1127_v62 }
  0xbc   :  { %1192 = vst [vmem:[#allocation9 + $0xc] sm:$0xff] %v1128_v0  ;;  %v1646_v3 = vpop.f32.mrf.mxu3 }
  0xbe   :  { %v653_v4 = vpop.f32.mrf.mxu2  ;;  %v478_v9 = vpop.f32.mrf.mxu0 }
  0xbf   :  { %v1035_v6 = vadd.f32 %v1639_v55, %v653_v4  ;;  %v1036_v10 = vadd.f32 %v1632_v47, %v478_v9  ;;  %v567_v11 = vpop.f32.mrf.mxu1 }
  0xc0   :  { %v1037_v13 = vadd.f32 %v1634_v48, %v567_v11 }
  0xc1   :  { %v1129_v12 = vpack.c.bf16 %v1035_v6, %v1035_v6  ;;  %517 = vmatmul.bf16.gmra.mxu0 %v297_v5  ;;  %715 = vmatmul.bf16.gmra.mxu3 %v1611_v23  ;;  %v276_v23 = vld [vmem:[#allocation3 + $0xa0] sm:$0xff] }
  0xc2   :  { %v1130_v14 = vpack.c.bf16 %v1037_v13, %v1036_v10  ;;  %606 = vmatmul.bf16.gmra.mxu1 %v297_v5  ;;  %v298_v30 = vpack.c.bf16 %v277_v25, %v276_v23 }
  0xc3   :  { %1193 = vst [vmem:[#allocation9 + $0x14] sm:$0xf] %v1129_v12  ;;  %695 = vmatmul.bf16.gmra.mxu2 %v297_v5 }
  0xc4   :  { %1194 = vst [vmem:[#allocation9 + $0x18] sm:$0xff] %v1130_v14  ;;  %v1652_v15 = vpop.f32.mrf.mxu3 }
  0xc6   :  { %v656_v18 = vpop.f32.mrf.mxu2  ;;  %v480_v20 = vpop.f32.mrf.mxu0 }
  0xc7   :  { %v1038_v19 = vadd.f32 %v1639_v55, %v656_v18  ;;  %v1039_v21 = vadd.f32 %v1632_v47, %v480_v20  ;;  %v569_v22 = vpop.f32.mrf.mxu1  ;;  %v1102_v20 = vadd.f32 %v1632_v47, %v1641_v56  ;;  %v1105_v56 = vadd.f32 %v1632_v47, %v1646_v3 }
  0xc8   :  { %v1040_v16 = vadd.f32 %v1634_v48, %v569_v22  ;;  %v1108_v3 = vadd.f32 %v1632_v47, %v1652_v15 }
  0xc9   :  { %v1131_v7 = vpack.c.bf16 %v1038_v19, %v1038_v19 }
  0xca   :  { %v1132_v24 = vpack.c.bf16 %v1040_v16, %v1039_v21 }
  0xcb   :  { %1195 = vst [vmem:[#allocation9 + $0x20] sm:$0xf] %v1131_v7 }
  0xcc   :  { %1196 = vst [vmem:[#allocation9 + $0x24] sm:$0xff] %v1132_v24  ;;  %v1657_v27 = vpop.f32.mrf.mxu3 }
  0xcd   :  { %v1111_v15 = vadd.f32 %v1632_v47, %v1657_v27 }
  0xce   :  { %v658_v29 = vpop.f32.mrf.mxu2  ;;  %v483_v32 = vpop.f32.mrf.mxu0 }
  0xcf   :  { %v1041_v31 = vadd.f32 %v1639_v55, %v658_v29  ;;  %v1042_v33 = vadd.f32 %v1632_v47, %v483_v32  ;;  %v572_v8 = vpop.f32.mrf.mxu1 }
  0xd0   :  { %v1043_v26 = vadd.f32 %v1634_v48, %v572_v8 }
  0xd1   :  { %v1133_v17 = vpack.c.bf16 %v1041_v31, %v1041_v31  ;;  %522 = vmatmul.bf16.gmra.mxu0 %v298_v30  ;;  %720 = vmatmul.bf16.gmra.mxu3 %v1615_v28  ;;  %v278_v28 = vld [vmem:[#allocation3 + $0xb0] sm:$0xff] }
  0xd2   :  { %v1134_v35 = vpack.c.bf16 %v1043_v26, %v1042_v33  ;;  %611 = vmatmul.bf16.gmra.mxu1 %v298_v30  ;;  %v299_v50 = vpack.c.bf16 %v279_v45, %v278_v28 }
  0xd3   :  { %1197 = vst [vmem:[#allocation9 + $0x2c] sm:$0xf] %v1133_v17  ;;  %700 = vmatmul.bf16.gmra.mxu2 %v298_v30 }
  0xd4   :  { %1198 = vst [vmem:[#allocation9 + $0x30] sm:$0xff] %v1134_v35  ;;  %v1663_v36 = vpop.f32.mrf.mxu3 }
  0xd5   :  { %v1114_v27 = vadd.f32 %v1632_v47, %v1663_v36 }
  0xd6   :  { %v661_v37 = vpop.f32.mrf.mxu2  ;;  %v485_v39 = vpop.f32.mrf.mxu0 }
  0xd7   :  { %v1044_v38 = vadd.f32 %v1639_v55, %v661_v37  ;;  %v1045_v40 = vadd.f32 %v1632_v47, %v485_v39  ;;  %v574_v41 = vpop.f32.mrf.mxu1 }
  0xd8   :  { %v1046_v43 = vadd.f32 %v1634_v48, %v574_v41 }
  0xd9   :  { %v1135_v42 = vpack.c.bf16 %v1044_v38, %v1044_v38 }
  0xda   :  { %v1136_v44 = vpack.c.bf16 %v1046_v43, %v1045_v40 }
  0xdb   :  { %1199 = vst [vmem:[#allocation9 + $0x38] sm:$0xf] %v1135_v42 }
  0xdc   :  { %1200 = vst [vmem:[#allocation9 + $0x3c] sm:$0xff] %v1136_v44  ;;  %v1668_v46 = vpop.f32.mrf.mxu3 }
  0xdd   :  { %v1117_v36 = vadd.f32 %v1632_v47, %v1668_v46 }
  0xde   :  { %v663_v49 = vpop.f32.mrf.mxu2  ;;  %v488_v52 = vpop.f32.mrf.mxu0 }
  0xdf   :  { %v1047_v51 = vadd.f32 %v1639_v55, %v663_v49  ;;  %v1048_v53 = vadd.f32 %v1632_v47, %v488_v52  ;;  %v577_v54 = vpop.f32.mrf.mxu1 }
  0xe0   :  { %v1049_v58 = vadd.f32 %v1634_v48, %v577_v54 }
  0xe1   :  { %v1137_v57 = vpack.c.bf16 %v1047_v51, %v1047_v51  ;;  %527 = vmatmul.bf16.gmra.mxu0 %v299_v50  ;;  %725 = vmatmul.bf16.gmra.mxu3 %v1622_v34 }
  0xe2   :  { %v1138_v59 = vpack.c.bf16 %v1049_v58, %v1048_v53  ;;  %616 = vmatmul.bf16.gmra.mxu1 %v299_v50 }
  0xe3   :  { %1201 = vst [vmem:[#allocation9 + $0x44] sm:$0xf] %v1137_v57  ;;  %705 = vmatmul.bf16.gmra.mxu2 %v299_v50 }
  0xe4   :  { %1202 = vst [vmem:[#allocation9 + $0x48] sm:$0xff] %v1138_v59  ;;  %v1674_v60 = vpop.f32.mrf.mxu3 }
  0xe5   :  { %v1120_v46 = vadd.f32 %v1632_v47, %v1674_v60 }
  0xe6   :  { %v666_v61 = vpop.f32.mrf.mxu2  ;;  %v490_v63 = vpop.f32.mrf.mxu0 }
  0xe7   :  { %v1050_v62 = vadd.f32 %v1639_v55, %v666_v61  ;;  %v1051_v0 = vadd.f32 %v1632_v47, %v490_v63  ;;  %v579_v1 = vpop.f32.mrf.mxu1 }
  0xe8   :  { %v1052_v4 = vadd.f32 %v1634_v48, %v579_v1 }
  0xe9   :  { %v1139_v2 = vpack.c.bf16 %v1050_v62, %v1050_v62 }
  0xea   :  { %v1140_v5 = vpack.c.bf16 %v1052_v4, %v1051_v0 }
  0xeb   :  { %1203 = vst [vmem:[#allocation9 + $0x50] sm:$0xf] %v1139_v2 }
  0xec   :  { %1204 = vst [vmem:[#allocation9 + $0x54] sm:$0xff] %v1140_v5  ;;  %v1679_v34 = vpop.f32.mrf.mxu3 }
  0xed   :  { %v1123_v60 = vadd.f32 %v1632_v47, %v1679_v34 }
  0xee   :  { %v668_v6 = vpop.f32.mrf.mxu2  ;;  %v493_v10 = vpop.f32.mrf.mxu0 }
  0xef   :  { %v1053_v9 = vadd.f32 %v1639_v55, %v668_v6  ;;  %v1054_v11 = vadd.f32 %v1632_v47, %v493_v10  ;;  %v582_v12 = vpop.f32.mrf.mxu1 }
  0xf0   :  { %v1055_v14 = vadd.f32 %v1634_v48, %v582_v12 }
  0xf1   :  { %v1141_v13 = vpack.c.bf16 %v1053_v9, %v1053_v9 }
  0xf2   :  { %v1142_v18 = vpack.c.bf16 %v1055_v14, %v1054_v11 }
  0xf3   :  { %1205 = vst [vmem:[#allocation9 + $0x5c] sm:$0xf] %v1141_v13 }
  0xf4   :  { %1206 = vst [vmem:[#allocation9 + $0x60] sm:$0xff] %v1142_v18  ;;  %v622_v19 = vpop.f32.mrf.mxu3 }
  0xf5   :  { %v1103_v21 = vadd.f32 %v1634_v48, %v622_v19 }
  0xf6   :  { %v671_v22 = vpop.f32.mrf.mxu2  ;;  %v495_v16 = vpop.f32.mrf.mxu0 }
  0xf7   :  { %v1056_v7 = vadd.f32 %v1639_v55, %v671_v22  ;;  %v1174_v24 = vpack.c.bf16 %v1103_v21, %v1102_v20  ;;  %v1057_v23 = vadd.f32 %v1632_v47, %v495_v16  ;;  %v584_v25 = vpop.f32.mrf.mxu1 }
  0xf8   :  { %v1058_v30 = vadd.f32 %v1634_v48, %v584_v25 }
  0xf9   :  { %v1143_v29 = vpack.c.bf16 %v1056_v7, %v1056_v7  ;;  %1238 = vst [vmem:[#allocation9 + $0x120] sm:$0xff] %v1174_v24 }
  0xfa   :  { %v1144_v31 = vpack.c.bf16 %v1058_v30, %v1057_v23 }
  0xfb   :  { %1207 = vst [vmem:[#allocation9 + $0x68] sm:$0xf] %v1143_v29 }
  0xfc   :  { %1208 = vst [vmem:[#allocation9 + $0x6c] sm:$0xff] %v1144_v31  ;;  %v624_v32 = vpop.f32.mrf.mxu3 }
  0xfd   :  { %v1106_v33 = vadd.f32 %v1634_v48, %v624_v32 }
  0xfe   :  { %v673_v8 = vpop.f32.mrf.mxu2  ;;  %v498_v26 = vpop.f32.mrf.mxu0 }
  0xff   :  { %v1059_v17 = vadd.f32 %v1639_v55, %v673_v8  ;;  %v1176_v35 = vpack.c.bf16 %v1106_v33, %v1105_v56  ;;  %v1060_v37 = vadd.f32 %v1632_v47, %v498_v26  ;;  %v587_v38 = vpop.f32.mrf.mxu1 }
 0x100   :  { %v1061_v40 = vadd.f32 %v1634_v48, %v587_v38 }
 0x101   :  { %v1145_v39 = vpack.c.bf16 %v1059_v17, %v1059_v17  ;;  %1240 = vst [vmem:[#allocation9 + $0x12c] sm:$0xff] %v1176_v35 }
 0x102   :  { %v1146_v41 = vpack.c.bf16 %v1061_v40, %v1060_v37 }
 0x103   :  { %1209 = vst [vmem:[#allocation9 + $0x74] sm:$0xf] %v1145_v39 }
 0x104   :  { %1210 = vst [vmem:[#allocation9 + $0x78] sm:$0xff] %v1146_v41  ;;  %v627_v42 = vpop.f32.mrf.mxu3 }
 0x105   :  { %v1109_v43 = vadd.f32 %v1634_v48, %v627_v42 }
 0x106   :  { %v676_v44 = vpop.f32.mrf.mxu2  ;;  %v500_v45 = vpop.f32.mrf.mxu0 }
 0x107   :  { %v1062_v28 = vadd.f32 %v1639_v55, %v676_v44  ;;  %v1178_v49 = vpack.c.bf16 %v1109_v43, %v1108_v3  ;;  %v1063_v50 = vadd.f32 %v1632_v47, %v500_v45  ;;  %v589_v51 = vpop.f32.mrf.mxu1 }
 0x108   :  { %v1064_v53 = vadd.f32 %v1634_v48, %v589_v51 }
 0x109   :  { %v1147_v52 = vpack.c.bf16 %v1062_v28, %v1062_v28  ;;  %1242 = vst [vmem:[#allocation9 + $0x138] sm:$0xff] %v1178_v49 }
 0x10a   :  { %v1148_v54 = vpack.c.bf16 %v1064_v53, %v1063_v50 }
 0x10b   :  { %1211 = vst [vmem:[#allocation9 + $0x80] sm:$0xf] %v1147_v52 }
 0x10c   :  { %1212 = vst [vmem:[#allocation9 + $0x84] sm:$0xff] %v1148_v54  ;;  %v629_v57 = vpop.f32.mrf.mxu3 }
 0x10d   :  { %v1112_v58 = vadd.f32 %v1634_v48, %v629_v57 }
 0x10e   :  { %v678_v59 = vpop.f32.mrf.mxu2  ;;  %v503_v62 = vpop.f32.mrf.mxu0 }
 0x10f   :  { %v1065_v61 = vadd.f32 %v1639_v55, %v678_v59  ;;  %v1180_v63 = vpack.c.bf16 %v1112_v58, %v1111_v15  ;;  %v1066_v0 = vadd.f32 %v1632_v47, %v503_v62  ;;  %v592_v1 = vpop.f32.mrf.mxu1 }
 0x110   :  { %v1067_v4 = vadd.f32 %v1634_v48, %v592_v1 }
 0x111   :  { %v1149_v2 = vpack.c.bf16 %v1065_v61, %v1065_v61  ;;  %1244 = vst [vmem:[#allocation9 + $0x144] sm:$0xff] %v1180_v63 }
 0x112   :  { %v1150_v5 = vpack.c.bf16 %v1067_v4, %v1066_v0 }
 0x113   :  { %1213 = vst [vmem:[#allocation9 + $0x8c] sm:$0xf] %v1149_v2 }
 0x114   :  { %1214 = vst [vmem:[#allocation9 + $0x90] sm:$0xff] %v1150_v5  ;;  %v632_v6 = vpop.f32.mrf.mxu3 }
 0x115   :  { %v1115_v9 = vadd.f32 %v1634_v48, %v632_v6 }
 0x116   :  { %v681_v10 = vpop.f32.mrf.mxu2  ;;  %v505_v12 = vpop.f32.mrf.mxu0 }
 0x117   :  { %v1068_v11 = vadd.f32 %v1639_v55, %v681_v10  ;;  %v1182_v13 = vpack.c.bf16 %v1115_v9, %v1114_v27  ;;  %v1069_v14 = vadd.f32 %v1632_v47, %v505_v12  ;;  %v594_v18 = vpop.f32.mrf.mxu1 }
 0x118   :  { %v1070_v20 = vadd.f32 %v1634_v48, %v594_v18 }
 0x119   :  { %v1151_v19 = vpack.c.bf16 %v1068_v11, %v1068_v11  ;;  %1246 = vst [vmem:[#allocation9 + $0x150] sm:$0xff] %v1182_v13 }
 0x11a   :  { %v1152_v21 = vpack.c.bf16 %v1070_v20, %v1069_v14 }
 0x11b   :  { %1215 = vst [vmem:[#allocation9 + $0x98] sm:$0xf] %v1151_v19 }
 0x11c   :  { %1216 = vst [vmem:[#allocation9 + $0x9c] sm:$0xff] %v1152_v21  ;;  %v634_v22 = vpop.f32.mrf.mxu3 }
 0x11d   :  { %v1118_v7 = vadd.f32 %v1634_v48, %v634_v22 }
 0x11e   :  { %v683_v16 = vpop.f32.mrf.mxu2  ;;  %v508_v23 = vpop.f32.mrf.mxu0 }
 0x11f   :  { %v1071_v24 = vadd.f32 %v1639_v55, %v683_v16  ;;  %v1184_v25 = vpack.c.bf16 %v1118_v7, %v1117_v36  ;;  %v1072_v29 = vadd.f32 %v1632_v47, %v508_v23  ;;  %v597_v30 = vpop.f32.mrf.mxu1 }
 0x120   :  { %v1073_v32 = vadd.f32 %v1634_v48, %v597_v30 }
 0x121   :  { %v1153_v31 = vpack.c.bf16 %v1071_v24, %v1071_v24  ;;  %1248 = vst [vmem:[#allocation9 + $0x15c] sm:$0xff] %v1184_v25 }
 0x122   :  { %v1154_v56 = vpack.c.bf16 %v1073_v32, %v1072_v29 }
 0x123   :  { %1217 = vst [vmem:[#allocation9 + $0xa4] sm:$0xf] %v1153_v31 }
 0x124   :  { %1218 = vst [vmem:[#allocation9 + $0xa8] sm:$0xff] %v1154_v56  ;;  %v637_v33 = vpop.f32.mrf.mxu3 }
 0x125   :  { %v1121_v8 = vadd.f32 %v1634_v48, %v637_v33 }
 0x126   :  { %v686_v17 = vpop.f32.mrf.mxu2  ;;  %v510_v35 = vpop.f32.mrf.mxu0 }
 0x127   :  { %v1074_v26 = vadd.f32 %v1639_v55, %v686_v17  ;;  %v1186_v37 = vpack.c.bf16 %v1121_v8, %v1120_v46  ;;  %v1075_v38 = vadd.f32 %v1632_v47, %v510_v35  ;;  %v599_v39 = vpop.f32.mrf.mxu1 }
 0x128   :  { %v1076_v41 = vadd.f32 %v1634_v48, %v599_v39 }
 0x129   :  { %v1155_v40 = vpack.c.bf16 %v1074_v26, %v1074_v26  ;;  %1250 = vst [vmem:[#allocation9 + $0x168] sm:$0xff] %v1186_v37 }
 0x12a   :  { %v1156_v42 = vpack.c.bf16 %v1076_v41, %v1075_v38 }
 0x12b   :  { %1219 = vst [vmem:[#allocation9 + $0xb0] sm:$0xf] %v1155_v40 }
 0x12c   :  { %1220 = vst [vmem:[#allocation9 + $0xb4] sm:$0xff] %v1156_v42  ;;  %v639_v3 = vpop.f32.mrf.mxu3 }
 0x12d   :  { %v1124_v43 = vadd.f32 %v1634_v48, %v639_v3 }
 0x12e   :  { %v688_v44 = vpop.f32.mrf.mxu2  ;;  %v513_v45 = vpop.f32.mrf.mxu0 }
 0x12f   :  { %v1077_v28 = vadd.f32 %v1639_v55, %v688_v44  ;;  %v1188_v49 = vpack.c.bf16 %v1124_v43, %v1123_v60  ;;  %v1078_v50 = vadd.f32 %v1632_v47, %v513_v45  ;;  %v602_v51 = vpop.f32.mrf.mxu1 }
 0x130   :  { %v1079_v53 = vadd.f32 %v1634_v48, %v602_v51 }
 0x131   :  { %v1157_v52 = vpack.c.bf16 %v1077_v28, %v1077_v28  ;;  %1252 = vst [vmem:[#allocation9 + $0x174] sm:$0xff] %v1188_v49 }
 0x132   :  { %v1158_v54 = vpack.c.bf16 %v1079_v53, %v1078_v50 }
 0x133   :  { %1221 = vst [vmem:[#allocation9 + $0xbc] sm:$0xf] %v1157_v52 }
 0x134   :  { %1222 = vst [vmem:[#allocation9 + $0xc0] sm:$0xff] %v1158_v54  ;;  %v711_v57 = vpop.f32.mrf.mxu3 }
 0x135   :  { %v1104_v34 = vadd.f32 %v1639_v55, %v711_v57 }
 0x136   :  { %v691_v15 = vpop.f32.mrf.mxu2  ;;  %v515_v59 = vpop.f32.mrf.mxu0 }
 0x137   :  { %v1080_v58 = vadd.f32 %v1639_v55, %v691_v15  ;;  %v1175_v61 = vpack.c.bf16 %v1104_v34, %v1104_v34  ;;  %v1081_v62 = vadd.f32 %v1632_v47, %v515_v59  ;;  %v604_v63 = vpop.f32.mrf.mxu1 }
 0x138   :  { %v1082_v1 = vadd.f32 %v1634_v48, %v604_v63 }
 0x139   :  { %v1159_v0 = vpack.c.bf16 %v1080_v58, %v1080_v58  ;;  %1239 = vst [vmem:[#allocation9 + $0x128] sm:$0xf] %v1175_v61 }
 0x13a   :  { %v1160_v2 = vpack.c.bf16 %v1082_v1, %v1081_v62 }
 0x13b   :  { %1223 = vst [vmem:[#allocation9 + $0xc8] sm:$0xf] %v1159_v0 }
 0x13c   :  { %1224 = vst [vmem:[#allocation9 + $0xcc] sm:$0xff] %v1160_v2  ;;  %v713_v4 = vpop.f32.mrf.mxu3 }
 0x13d   :  { %v1107_v6 = vadd.f32 %v1639_v55, %v713_v4 }
 0x13e   :  { %v693_v5 = vpop.f32.mrf.mxu2  ;;  %v518_v9 = vpop.f32.mrf.mxu0 }
 0x13f   :  { %v1083_v27 = vadd.f32 %v1639_v55, %v693_v5  ;;  %v1177_v10 = vpack.c.bf16 %v1107_v6, %v1107_v6  ;;  %v1084_v11 = vadd.f32 %v1632_v47, %v518_v9  ;;  %v607_v12 = vpop.f32.mrf.mxu1 }
 0x140   :  { %v1085_v14 = vadd.f32 %v1634_v48, %v607_v12 }
 0x141   :  { %v1161_v13 = vpack.c.bf16 %v1083_v27, %v1083_v27  ;;  %1241 = vst [vmem:[#allocation9 + $0x134] sm:$0xf] %v1177_v10 }
 0x142   :  { %v1162_v18 = vpack.c.bf16 %v1085_v14, %v1084_v11 }
 0x143   :  { %1225 = vst [vmem:[#allocation9 + $0xd4] sm:$0xf] %v1161_v13 }
 0x144   :  { %1226 = vst [vmem:[#allocation9 + $0xd8] sm:$0xff] %v1162_v18  ;;  %v716_v19 = vpop.f32.mrf.mxu3 }
 0x145   :  { %v1110_v21 = vadd.f32 %v1639_v55, %v716_v19 }
 0x146   :  { %v696_v20 = vpop.f32.mrf.mxu2  ;;  %v520_v36 = vpop.f32.mrf.mxu0 }
 0x147   :  { %v1086_v22 = vadd.f32 %v1639_v55, %v696_v20  ;;  %v1179_v7 = vpack.c.bf16 %v1110_v21, %v1110_v21  ;;  %v1087_v16 = vadd.f32 %v1632_v47, %v520_v36  ;;  %v609_v24 = vpop.f32.mrf.mxu1 }
 0x148   :  { %v1088_v25 = vadd.f32 %v1634_v48, %v609_v24 }
 0x149   :  { %v1163_v23 = vpack.c.bf16 %v1086_v22, %v1086_v22  ;;  %1243 = vst [vmem:[#allocation9 + $0x140] sm:$0xf] %v1179_v7 }
 0x14a   :  { %v1164_v29 = vpack.c.bf16 %v1088_v25, %v1087_v16 }
 0x14b   :  { %1227 = vst [vmem:[#allocation9 + $0xe0] sm:$0xf] %v1163_v23 }
 0x14c   :  { %1228 = vst [vmem:[#allocation9 + $0xe4] sm:$0xff] %v1164_v29  ;;  %v718_v30 = vpop.f32.mrf.mxu3 }
 0x14d   :  { %v1113_v32 = vadd.f32 %v1639_v55, %v718_v30 }
 0x14e   :  { %v698_v31 = vpop.f32.mrf.mxu2  ;;  %v523_v33 = vpop.f32.mrf.mxu0 }
 0x14f   :  { %v1089_v56 = vadd.f32 %v1639_v55, %v698_v31  ;;  %v1181_v46 = vpack.c.bf16 %v1113_v32, %v1113_v32  ;;  %v1090_v8 = vadd.f32 %v1632_v47, %v523_v33  ;;  %v612_v17 = vpop.f32.mrf.mxu1 }
 0x150   :  { %v1091_v35 = vadd.f32 %v1634_v48, %v612_v17 }
 0x151   :  { %v1165_v26 = vpack.c.bf16 %v1089_v56, %v1089_v56  ;;  %1245 = vst [vmem:[#allocation9 + $0x14c] sm:$0xf] %v1181_v46 }
 0x152   :  { %v1166_v37 = vpack.c.bf16 %v1091_v35, %v1090_v8 }
 0x153   :  { %1229 = vst [vmem:[#allocation9 + $0xec] sm:$0xf] %v1165_v26 }
 0x154   :  { %1230 = vst [vmem:[#allocation9 + $0xf0] sm:$0xff] %v1166_v37  ;;  %v721_v38 = vpop.f32.mrf.mxu3 }
 0x155   :  { %v1116_v40 = vadd.f32 %v1639_v55, %v721_v38 }
 0x156   :  { %v701_v39 = vpop.f32.mrf.mxu2  ;;  %v525_v42 = vpop.f32.mrf.mxu0 }
 0x157   :  { %v1092_v41 = vadd.f32 %v1639_v55, %v701_v39  ;;  %v1183_v3 = vpack.c.bf16 %v1116_v40, %v1116_v40  ;;  %v1093_v60 = vadd.f32 %v1632_v47, %v525_v42  ;;  %v614_v43 = vpop.f32.mrf.mxu1 }
 0x158   :  { %v1094_v28 = vadd.f32 %v1634_v48, %v614_v43 }
 0x159   :  { %v1167_v44 = vpack.c.bf16 %v1092_v41, %v1092_v41  ;;  %1247 = vst [vmem:[#allocation9 + $0x158] sm:$0xf] %v1183_v3 }
 0x15a   :  { %v1168_v45 = vpack.c.bf16 %v1094_v28, %v1093_v60 }
 0x15b   :  { %1231 = vst [vmem:[#allocation9 + $0xf8] sm:$0xf] %v1167_v44 }
 0x15c   :  { %1232 = vst [vmem:[#allocation9 + $0xfc] sm:$0xff] %v1168_v45  ;;  %v723_v49 = vpop.f32.mrf.mxu3 }
 0x15d   :  { %v1119_v51 = vadd.f32 %v1639_v55, %v723_v49 }
 0x15e   :  { %v703_v50 = vpop.f32.mrf.mxu2  ;;  %v528_v53 = vpop.f32.mrf.mxu0 }
 0x15f   :  { %v1095_v52 = vadd.f32 %v1639_v55, %v703_v50  ;;  %v1185_v54 = vpack.c.bf16 %v1119_v51, %v1119_v51  ;;  %v1096_v57 = vadd.f32 %v1632_v47, %v528_v53  ;;  %v617_v15 = vpop.f32.mrf.mxu1 }
 0x160   :  { %v1097_v58 = vadd.f32 %v1634_v48, %v617_v15 }
 0x161   :  { %v1169_v34 = vpack.c.bf16 %v1095_v52, %v1095_v52  ;;  %1249 = vst [vmem:[#allocation9 + $0x164] sm:$0xf] %v1185_v54 }
 0x162   :  { %v1170_v59 = vpack.c.bf16 %v1097_v58, %v1096_v57 }
 0x163   :  { %1233 = vst [vmem:[#allocation9 + $0x104] sm:$0xf] %v1169_v34 }
 0x164   :  { %1234 = vst [vmem:[#allocation9 + $0x108] sm:$0xff] %v1170_v59  ;;  %v726_v61 = vpop.f32.mrf.mxu3 }
 0x165   :  { %v1122_v63 = vadd.f32 %v1639_v55, %v726_v61 }
 0x166   :  { %v706_v62 = vpop.f32.mrf.mxu2  ;;  %v530_v1 = vpop.f32.mrf.mxu0 }
 0x167   :  { %v1098_v0 = vadd.f32 %v1639_v55, %v706_v62  ;;  %v1187_v2 = vpack.c.bf16 %v1122_v63, %v1122_v63  ;;  %v1099_v4 = vadd.f32 %v1632_v47, %v530_v1  ;;  %v619_v5 = vpop.f32.mrf.mxu1 }
 0x168   :  { %v1100_v27 = vadd.f32 %v1634_v48, %v619_v5 }
 0x169   :  { %v1171_v6 = vpack.c.bf16 %v1098_v0, %v1098_v0  ;;  %1251 = vst [vmem:[#allocation9 + $0x170] sm:$0xf] %v1187_v2 }
 0x16a   :  { %v1172_v9 = vpack.c.bf16 %v1100_v27, %v1099_v4 }
 0x16b   :  { %1235 = vst [vmem:[#allocation9 + $0x110] sm:$0xf] %v1171_v6 }
 0x16c   :  { %1236 = vst [vmem:[#allocation9 + $0x114] sm:$0xff] %v1172_v9  ;;  %v728_v10 = vpop.f32.mrf.mxu3 }
 0x16d   :  { %v1125_v12 = vadd.f32 %v1639_v55, %v728_v10 }
 0x16e   :  { %v708_v11 = vpop.f32.mrf.mxu2 }
 0x16f   :  { %v1101_v47 = vadd.f32 %v1639_v55, %v708_v11  ;;  %v1189_v13 = vpack.c.bf16 %v1125_v12, %v1125_v12 }
 0x171   :  { %v1173_v14 = vpack.c.bf16 %v1101_v47, %v1101_v47  ;;  %1253 = vst [vmem:[#allocation9 + $0x17c] sm:$0xf] %v1189_v13 }
 0x173   :  { %1237 = vst [vmem:[#allocation9 + $0x11c] sm:$0xf] %v1173_v14 }
 0x174   :  { %1266 = dma.vmem_to_hbm [thread:$0]  %s1259_s29, 6144, %s1261_s5, [#allocation5], %s1529_s20, %s1529_s20, %s1530_s21  }
 0x175   :  { %1526 = dma.done.wait [#allocation5], 6144  }
 0x176   :  { %1527 = vsyncadd [#allocation5], 4294961152 }
 0x177   :  { %1271 = vsyncpa [#allocation4], 1 }
 0x178   :  { %1272 = vsyncpa [#allocation7], 1 }
 0x179   :  { %1273 = vsyncpa [#allocation5], 1 }

</bundles_post_ra>
